<compile_context>
chip_gen: v6e
topology: v6e:2x2x1
jax: 0.10.0
libtpu: 0.0.40
codegen_flags: <defaults>
</compile_context>

<pallas_src>
import jax
import jax.numpy as jnp
from jax.experimental import pallas as pl
from jax.experimental.pallas import tpu as pltpu

LANE = 128
ROW_ALIGN = 32  # keeps int8 (32,128) / bf16 (16,128) sublane tiling aligned


def _round_up(v, m):
    return (v + m - 1) // m * m


def _vmem_capacity_bytes():
    try:
        info = pltpu.get_tpu_info()
        cap = getattr(info, "vmem_capacity_bytes", None)
        if cap:
            return int(cap)
    except Exception:
        pass
    return 64 << 20  # v7x-safe fallback (v5e/v6e have 128 MiB)


def _residual_kernel(xwl_ref, a_ref, xwc_ref, o_ref):
    # xwl_ref: [tm, C_out_pad] f32        -- hoisted lin branch  X @ Wl^T (streamed)
    # a_ref  : [tm, N]         int8|f32   -- adjacency row block (dominant HBM stream)
    # xwc_ref: [N, C_out_pad]  bf16|f32   -- hoisted conv proj   X @ Wc^T (grid-invariant)
    # o_ref  : [tm, C_out_pad] f32
    conv = jnp.dot(a_ref[...].astype(xwc_ref.dtype), xwc_ref[...],
                   preferred_element_type=jnp.float32)
    o_ref[...] = (xwl_ref[...] + conv).astype(o_ref.dtype)


def _pick_tile(n_rows, n_cols, c_out_pad, *, a_bytes, xwc_bytes, tm_max, vmem_budget):
    """Row block: multiple of 32, <= n/2 (>=2 grid steps), min padded work, max tm."""
    # Grid-invariant XWc; still double-buffered by the pipeline.
    # TODO(synk): pl.Buffered(1) on the XWc spec would halve this term on v7x.
    resident = 2 * n_cols * c_out_pad * xwc_bytes
    if n_rows >= 2 * ROW_ALIGN:
        cap = max(ROW_ALIGN, ROW_ALIGN * (n_rows // (2 * ROW_ALIGN)))
    else:
        cap = ROW_ALIGN
    cap = min(cap, max(ROW_ALIGN, _round_up(tm_max, ROW_ALIGN)))

    # bf16 upcast temp only exists when adjacency is stored narrower than XWc.
    tmp_per_row = n_cols * xwc_bytes if a_bytes < xwc_bytes else 0

    best = None
    for tm in range(ROW_ALIGN, cap + 1, ROW_ALIGN):
        per_step = (2 * tm * n_cols * a_bytes      # adjacency block (double-buffered)
                    + tm * tmp_per_row             # in-kernel bf16 cast temp
                    + 2 * tm * c_out_pad * 4       # streamed XWl block
                    + 2 * tm * c_out_pad * 4)      # output block
        if resident + per_step > vmem_budget:
            break
        key = (_round_up(n_rows, tm), -tm)         # minimize padded work, then maximize tm
        if best is None or key < best[0]:
            best = (key, tm, resident + per_step)
    if best is None:
        # TODO(synk): block the adjacency-column (reduction) axis instead of failing.
        raise ValueError("ResidualWrapper kernel: adjacency row block does not fit VMEM")
    return best[1], best[2]


def residual_wrapper_forward(x, adj, w_lin, w_conv, *, tm_max=1024,
                             vmem_budget_bytes=None):
    """out = x @ w_lin^T + adj @ (x @ w_conv^T)  (residual add + dominant matmul in Pallas)."""
    x = jnp.asarray(x, jnp.float32)
    adj = jnp.asarray(adj)
    w_lin = jnp.asarray(w_lin, jnp.float32)
    w_conv = jnp.asarray(w_conv, jnp.float32)

    n, c_in = x.shape
    c_out = w_lin.shape[0]
    assert adj.shape == (n, n)
    c_out_pad = _round_up(c_out, LANE)

    # Lane-padded, pre-transposed weights -> lane-dense (unmasked) output stores.
    wl_t = jnp.zeros((c_in, c_out_pad), jnp.float32).at[:, :c_out].set(w_lin.T)
    wc_t = jnp.zeros((c_in, c_out_pad), jnp.float32).at[:, :c_out].set(w_conv.T)

    # Hoist both tiny projections (O(N*Cin*Cout), negligible HBM traffic).
    hi = jax.lax.Precision.HIGHEST
    xwl = jnp.dot(x, wl_t, precision=hi)   # lin branch, stays f32
    xwc = jnp.dot(x, wc_t, precision=hi)   # conv projection, resident operand

    # Downcast the dominant N*N stream only when adjacency is an exact 0/1 mask:
    # int8 in HBM (1 B/elem), bf16 upcast in-kernel, bf16 MXU dot with f32 accumulation.
    try:
        is_binary = bool(jnp.all((adj == 0) | (adj == 1)))
    except Exception:  # abstract value under tracing -> keep full precision
        is_binary = False
    if is_binary:
        adj_stream = adj.astype(jnp.int8)
        xwc = xwc.astype(jnp.bfloat16)
    else:
        # TODO(synk): weighted/normalized adjacency (e.g. D^-1/2 A D^-1/2) keeps f32.
        adj_stream = adj.astype(jnp.float32)

    a_bytes = adj_stream.dtype.itemsize
    xwc_bytes = xwc.dtype.itemsize

    vmem_cap = _vmem_capacity_bytes()
    budget = int(vmem_cap * 0.7) if vmem_budget_bytes is None else int(vmem_budget_bytes)

    tm, vmem_needed = _pick_tile(n, n, c_out_pad, a_bytes=a_bytes, xwc_bytes=xwc_bytes,
                                 tm_max=tm_max, vmem_budget=budget)

    # Pad the row (grid) axis so every block is full; padded rows are zero, sliced off.
    n_pad = _round_up(n, tm)
    if n_pad != n:
        adj_stream = jnp.pad(adj_stream, ((0, n_pad - n), (0, 0)))
        xwl = jnp.pad(xwl, ((0, n_pad - n), (0, 0)))

    vmem_limit = int(min(max(vmem_needed + (8 << 20), 32 << 20), vmem_cap - (4 << 20)))

    cost = pl.CostEstimate(
        flops=2 * n_pad * n * c_out_pad + n_pad * c_out_pad,
        transcendentals=0,
        bytes_accessed=(n_pad * n * a_bytes            # adjacency -- dominant
                        + n * c_out_pad * xwc_bytes    # resident XWc
                        + n_pad * c_out_pad * 4        # streamed XWl
                        + n_pad * c_out_pad * 4),      # output
    )

    out_pad = pl.pallas_call(
        _residual_kernel,
        out_shape=jax.ShapeDtypeStruct((n_pad, c_out_pad), jnp.float32),
        grid_spec=pltpu.PrefetchScalarGridSpec(
            num_scalar_prefetch=0,
            grid=(n_pad // tm,),
            in_specs=[
                pl.BlockSpec((tm, c_out_pad), lambda i: (i, 0)),   # XWl row block
                pl.BlockSpec((tm, n), lambda i: (i, 0)),           # adjacency row block
                pl.BlockSpec((n, c_out_pad), lambda i: (0, 0)),    # XWc (grid-invariant)
            ],
            out_specs=pl.BlockSpec((tm, c_out_pad), lambda i: (i, 0)),
        ),
        compiler_params=pltpu.CompilerParams(
            dimension_semantics=("parallel",),
            vmem_limit_bytes=vmem_limit),
        cost_estimate=cost,
    )(xwl, adj_stream, xwc)

    return out_pad[:n, :c_out]


if __name__ == "__main__":
    # small, deterministic problem (c_out deliberately not a multiple of 128)
    N, C_IN, C_OUT = 512, 32, 48

    key = jax.random.PRNGKey(0)
    kx, ka, kl, kc = jax.random.split(key, 4)

    x = jax.random.normal(kx, (N, C_IN), dtype=jnp.float32)
    adj = (jax.random.uniform(ka, (N, N)) < 0.1).astype(jnp.float32)   # 0/1 mask

    # deterministic init mimicking nn.Linear.reset_parameters: U(-1/sqrt(fan_in), +)
    bound = 1.0 / jnp.sqrt(jnp.float32(C_IN))
    w_lin = jax.random.uniform(kl, (C_OUT, C_IN), jnp.float32, -bound, bound)
    w_conv = jax.random.uniform(kc, (C_OUT, C_IN), jnp.float32, -bound, bound)

    out = residual_wrapper_forward(x, adj, w_lin, w_conv)
    out = jax.block_until_ready(out)

    # pure-JAX reference of ResidualWrapper.forward (f32, highest precision)
    hi = jax.lax.Precision.HIGHEST
    ref = (jnp.dot(x, w_lin.T, precision=hi)
           + jnp.dot(adj, jnp.dot(x, w_conv.T, precision=hi), precision=hi))
    assert out.shape == (N, C_OUT)
    max_err = float(jnp.max(jnp.abs(out - ref)))
    # XWc streamed in bf16 (adjacency 0/1 exact, f32 accumulation) -> ~1e-2 rounding
    assert jnp.allclose(out, ref, atol=1e-1, rtol=1e-2), f"mismatch vs reference: {max_err}"

    print("KERNEL_OK")
</pallas_src>

<mosaic_0001>
module attributes {stable_mosaic.version = 11 : i64} {
  func.func @_residual_kernel(%arg0: i32, %arg1: memref<256x128xf32, #tpu.memory_space<vmem>>, %arg2: memref<256x512xi8, #tpu.memory_space<vmem>>, %arg3: memref<512x128xbf16, #tpu.memory_space<vmem>>, %arg4: memref<256x128xf32, #tpu.memory_space<vmem>>) attributes {dimension_semantics = [#tpu.dimension_semantics<parallel>], iteration_bounds = array<i64: 2>, scalar_prefetch = 0 : i64, scratch_operands = 0 : i64, tpu.core_type = #tpu.core_type<tc>, window_params = [{transform_indices = @transform_0, window_bounds = array<i64: 256, 128>}, {transform_indices = @transform_1, window_bounds = array<i64: 256, 512>}, {pipeline_mode = #tpu.pipeline_mode<synchronous>, transform_indices = @transform_2, window_bounds = array<i64: 512, 128>}, {transform_indices = @transform_3, window_bounds = array<i64: 256, 128>}]} {
    %c0 = arith.constant 0 : index
    %c0_0 = arith.constant 0 : index
    %0 = vector.load %arg2[%c0, %c0_0] : memref<256x512xi8, #tpu.memory_space<vmem>>, vector<256x512xi8>
    %1 = arith.sitofp %0 : vector<256x512xi8> to vector<256x512xbf16>
    %c0_1 = arith.constant 0 : index
    %c0_2 = arith.constant 0 : index
    %2 = vector.load %arg3[%c0_1, %c0_2] : memref<512x128xbf16, #tpu.memory_space<vmem>>, vector<512x128xbf16>
    %cst = arith.constant dense<0.000000e+00> : vector<256x128xf32>
    %3 = tpu.matmul %1, %2, %cst {dimension_numbers = #tpu.dot_dimension_numbers<[1], [0], [0], [1], [0, 0, 1, 1], [], []>} : vector<256x512xbf16>, vector<512x128xbf16>, vector<256x128xf32> -> vector<256x128xf32>
    %c0_3 = arith.constant 0 : index
    %c0_4 = arith.constant 0 : index
    %4 = vector.load %arg1[%c0_3, %c0_4] : memref<256x128xf32, #tpu.memory_space<vmem>>, vector<256x128xf32>
    %5 = arith.addf %4, %3 : vector<256x128xf32>
    %c0_5 = arith.constant 0 : index
    %c0_6 = arith.constant 0 : index
    %6 = vector.load %arg4[%c0_5, %c0_6] : memref<256x128xf32, #tpu.memory_space<vmem>>, vector<256x128xf32>
    tpu.vector_store %arg4[%c0_5, %c0_6], %5 {strides = array<i32>} : memref<256x128xf32, #tpu.memory_space<vmem>>, vector<256x128xf32>,
    return
  }
  func.func @transform_0(%arg0: i32) -> (i32, i32) {
    %c0_i32 = arith.constant 0 : i32
    %c0_i32_0 = arith.constant 0 : i32
    return %arg0, %c0_i32 : i32, i32
  }
  func.func @transform_1(%arg0: i32) -> (i32, i32) {
    %c0_i32 = arith.constant 0 : i32
    %c0_i32_0 = arith.constant 0 : i32
    return %arg0, %c0_i32 : i32, i32
  }
  func.func @transform_2(%arg0: i32) -> (i32, i32) {
    %c0_i32 = arith.constant 0 : i32
    %c0_i32_0 = arith.constant 0 : i32
    %c0_i32_1 = arith.constant 0 : i32
    return %c0_i32, %c0_i32_0 : i32, i32
  }
  func.func @transform_3(%arg0: i32) -> (i32, i32) {
    %c0_i32 = arith.constant 0 : i32
    %c0_i32_0 = arith.constant 0 : i32
    return %arg0, %c0_i32 : i32, i32
  }
}

</mosaic_0001>

<bundles_post_ra>
// kernel: tpu_custom_call.1
= control target key start
LH: loop header
LB: loop body
LE: loop exit
PB: predicated region body
PF: predicated region fallthrough
CT: control target
= control target key end

     0   :  { %8 = vsyncpa [#allocation3], 0  ;;  %s2045_s0 = inlined_call_operand.hbm [shape: f32[512,128], index: 0, kind: input, shape index: {}]   ;;  %s2046_s1 = inlined_call_operand.hbm [shape: s8[512,512], index: 1, kind: input, shape index: {}]   ;;  %s2047_s2 = inlined_call_operand.hbm [shape: bf16[512,128], index: 2, kind: input, shape index: {}]   ;;  %s2048_s3 = inlined_call_operand.hbm [shape: f32[512,128], index: 3, kind: output, shape index: {}]  }
   0x1   :  { %10 = vsyncpa [#allocation3 + $0x1], 0 }
   0x2   :  { %11 = vsyncpa [#allocation6], 0 }
   0x3   :  { %13 = vsyncpa [#allocation6 + $0x1], 0 }
   0x4   :  { %14 = vsyncpa [#allocation4], 0 }
   0x5   :  { %16 = vsyncpa [#allocation4 + $0x1], 0  ;;  %s1708_s12 = smov 0   ;;  %s1710_s13 = smov 0  }
   0x6   :  { %s1712_s14 = smov 0   ;;  %s1714_s15 = smov 0  }
   0x7 LB: > { %s1729_s16 = sadd.s32 4294967295, %s1674_s15   ;;  %s1137_s17 = sadd.s32 4294967294, %s1674_s15   ;;  %s1674_s15 = sphi %s1714_s15, %s2068_s15   ;;  %s1670_s14 = sphi %s1712_s14, %s2067_s14   ;;  %s1666_s13 = sphi %s1710_s13, %s2066_s13   ;;  %s1662_s12 = sphi %s1708_s12, %s2065_s12  }
   0x8   : > { %p42_p0 = scmp.ne.s32.totalorder %s1666_s13, %s1662_s12  ;;  %p2049_p1 = scmp.eq.s32.totalorder %s1729_s16, 0 }
   0x9   : > { %p119_p3 = scmp.eq.s32.totalorder %s1137_s17, 1  ;;  %p1138_p5 = scmp.ge.s32.totalorder %s1674_s15, 1 }
   0xa   : > { %p1738_p4 = por %p2049_p1, %p42_p0  ;;  %p126_p7 = scmp.lt.s32.totalorder %s1674_s15, 3 }
   0xb   : > { %p1743_p6 = por %p119_p3, %p42_p0  ;;  %s1676_s21 = smov [#allocation7]  }
   0xc   : > { %s2052_s18 = scalar_select %p1738_p4, 1, 0 }
   0xd   : > { %s2053_s19 = scalar_select %p1743_p6, 1, 0 }
   0xe   : > { %p1748_p8 = pnand %p1138_p5, %p126_p7  ;;  %s138_s22 = sshll.u32 %s1676_s21, 4  ;;  %s139_s22 = int_to_ptr.vmem [resolvable:$true] %s138_s22 }
   0xf   : > { %s1762_s24 = sadd.s32 1, %s1674_s15   ;;  %s29_s25 = sadd.s32 1, %s1670_s14 }
  0x10   : > { %p1428_p9 = pneg %p1748_p8  ;;  %s26_s26 = ssub.s32 %s1674_s15, %s1762_s24 }
  0x11   : > { %s1531_s27 = scalar_lea.vmem %s139_s22, 4096  ;;  %p1539_p5 = scmp.lt.s32.totalorder %s139_s22, %s139_s22 }
  0x12   : > { %p1757_p11 = pnand %p1428_p9, %p2049_p1  ;;  %p1532_p13 = scmp.ne.s32.totalorder %s139_s22, %s1531_s27 }
  0x13   : > { %p1540_p7 = scmp.lt.s32.totalorder %s1531_s27, %s1531_s27 }
  0x14   : > { %p1522_p12 = pneg %p1757_p11 }
  0x15   : > { %p1541_p10 = por %p1540_p7, %p1539_p5 }
  0x16   : > { %p1534_p0 = pnand %p1532_p13, %p1522_p12 }
  0x18   : > { %p1535_p3 = pneg %p1534_p0 }
  0x1a   : > { %p1542_p2 = pnand %p1541_p10, %p1535_p3 }
  0x1c   : > { %1545 = shalt.err (!%p1542_p2)
}
  0x1d   : > { %s1677_s28 = smov 64   ;;  %s1678_s29 = smov 4  }
  0x1e   : > { %1431 = dma.hbm_to_vmem [thread:$0]  (!%p1757_p11), %s2047_s2, 4096, %s139_s22, [#allocation6], %s1677_s28, %s1677_s28, %s1678_s29  }
  0x1f   : > { %p27_p9 = scmp.eq.s32.totalorder %s26_s26, 0  ;;  %p36_p10 = scmp.ne.s32.totalorder %s1670_s14, %s1666_s13 }
  0x20   : > { %p37_p2 = scmp.eq.s32.totalorder %s1674_s15, 0  ;;  %p1444_p12 = scmp.lt.s32.totalorder %s1674_s15, 2 }
  0x21   : > { %s1779_s5 = scalar_select %p27_p9, %s1670_s14, %s29_s25  }
  0x22   : > { %p38_p13 = por %p37_p2, %p36_p10  ;;  %p2056_p0 = scmp.eq.s32.totalorder %s1729_s16, 1 }
  0x23   : > { %s152_s7 = sand.u32 1, %s1670_s14   ;;  %s1190_s8 = sshll.u32 %s1674_s15, 12 }
  0x24   : > { %p1783_p3 = por %p2056_p0, %p36_p10  ;;  %s1789_s9 = sshll.u32 %s152_s7, 8 }
  0x25   : > { %s1796_s17 = scalar_lea.hbm %s2045_s0, %s1190_s8  ;;  %s156_s21 = scalar_lea.vmem [#allocation2], %s1789_s9 }
  0x26   : > { %s2057_s6 = scalar_select %p1783_p3, 1, 0 }
  0x27   : > { %s163_s22 = sshll.u32 %s156_s21, 4  ;;  %p1799_p11 = pnand %p1444_p12, %p38_p13  ;;  %s1803_s22 = int_to_ptr.vmem [resolvable:$true] %s163_s22 }
  0x28   : > { %s1805_s25 = scalar_lea.sflag [#allocation3], %s152_s7  ;;  %s1546_s26 = scalar_lea.hbm %s1796_s17, 4096 }
  0x29   : > { %p1547_p5 = scmp.ne.s32.totalorder %s1796_s17, %s1546_s26  ;;  %p1548_p7 = pneg %p1799_p11 }
  0x2a   : > { %s1551_s29 = scalar_lea.hbm %s2045_s0, 8192  ;;  %p1552_p2 = scmp.lt.s32.totalorder %s1796_s17, %s2045_s0 }
  0x2b   : > { %p1549_p9 = pnand %p1548_p7, %p1547_p5  ;;  %p1553_p12 = scmp.lt.s32.totalorder %s1551_s29, %s1546_s26 }
  0x2d   : > { %p1550_p10 = pneg %p1549_p9  ;;  %p1554_p13 = por %p1553_p12, %p1552_p2 }
  0x2f   : > { %p1555_p0 = pnand %p1554_p13, %p1550_p10 }
  0x31   : > { %1558 = shalt.err (!%p1555_p0)
}
  0x32   : > { %s1559_s7 = scalar_lea.vmem %s1803_s22, 4096  ;;  %s1679_s10 = smov [#allocation2]  }
  0x33   : > { %p1560_p1 = scmp.ne.s32.totalorder %s1803_s22, %s1559_s7  ;;  %s1564_s11 = sshll.u32 %s1679_s10, 4  ;;  %s1565_s11 = int_to_ptr.vmem [resolvable:$false] %s1564_s11 }
  0x34   : > { %s1566_s21 = scalar_lea.vmem %s1565_s11, 8192  ;;  %p1567_p6 = scmp.lt.s32.totalorder %s1803_s22, %s1565_s11 }
  0x35   : > { %p1562_p5 = pnand %p1560_p1, %p1548_p7  ;;  %p1568_p3 = scmp.lt.s32.totalorder %s1566_s21, %s1559_s7 }
  0x37   : > { %p1563_p9 = pneg %p1562_p5  ;;  %p1569_p4 = por %p1568_p3, %p1567_p6 }
  0x39   : > { %p1570_p2 = pnand %p1569_p4, %p1563_p9 }
  0x3b   : > { %1573 = shalt.err (!%p1570_p2)
}
  0x3c   : > { %s1680_s26 = smov 128   ;;  %s1681_s27 = smov 8  }
  0x3d   : > { %1435 = dma.hbm_to_vmem [thread:$0]  (!%p1799_p11), %s1796_s17, 4096, %s1803_s22, %s1805_s25, %s1680_s26, %s1680_s26, %s1681_s27  }
  0x3e   : > { %s1837_s30 = scalar_lea.hbm %s2046_s1, %s1190_s8  ;;  %s177_s4 = scalar_lea.vmem [#allocation5], %s1789_s9 }
  0x3f   : > { %s185_s7 = sshll.u32 %s177_s4, 4  ;;  %s173_s10 = sand.u32 1, %s1674_s15   ;;  %s1841_s7 = int_to_ptr.vmem [resolvable:$true] %s185_s7 }
  0x40   : > { %s1843_s11 = scalar_lea.sflag [#allocation6], %s173_s10  ;;  %s1574_s21 = scalar_lea.hbm %s1837_s30, 4096 }
  0x41   : > { %p1575_p1 = scmp.ne.s32.totalorder %s1837_s30, %s1574_s21  ;;  %s1579_s8 = scalar_lea.hbm %s2046_s1, 8192 }
  0x42   : > { %p1580_p3 = scmp.lt.s32.totalorder %s1837_s30, %s2046_s1  ;;  %p1581_p10 = scmp.lt.s32.totalorder %s1579_s8, %s1574_s21 }
  0x43   : > { %p1577_p4 = pnand %p1575_p1, %p1548_p7 }
  0x44   : > { %p1582_p12 = por %p1581_p10, %p1580_p3 }
  0x45   : > { %p1578_p6 = pneg %p1577_p4 }
  0x47   : > { %p1583_p13 = pnand %p1582_p12, %p1578_p6 }
  0x49   : > { %1586 = shalt.err (!%p1583_p13)
}
  0x4a   : > { %s1587_s9 = scalar_lea.vmem %s1841_s7, 4096  ;;  %s1682_s27 = smov [#allocation5]  }
  0x4b   : > { %p1588_p0 = scmp.ne.s32.totalorder %s1841_s7, %s1587_s9  ;;  %s1592_s28 = sshll.u32 %s1682_s27, 4  ;;  %s1593_s28 = int_to_ptr.vmem [resolvable:$false] %s1592_s28 }
  0x4c   : > { %s1594_s29 = scalar_lea.vmem %s1593_s28, 8192  ;;  %p1595_p2 = scmp.lt.s32.totalorder %s1841_s7, %s1593_s28 }
  0x4d   : > { %p1590_p5 = pnand %p1588_p0, %p1548_p7  ;;  %p1596_p1 = scmp.lt.s32.totalorder %s1594_s29, %s1587_s9 }
  0x4f   : > { %p1591_p9 = pneg %p1590_p5  ;;  %p1597_p4 = por %p1596_p1, %p1595_p2 }
  0x51   : > { %p1598_p3 = pnand %p1597_p4, %p1591_p9 }
  0x53   : > { %1601 = shalt.err (!%p1598_p3)
}
  0x54   : > { %s1683_s4 = smov 512   ;;  %s1684_s10 = smov 32  }
  0x55   : > { %1438 = dma.hbm_to_vmem [thread:$0]  (!%p1799_p11), %s1837_s30, 4096, %s1841_s7, %s1843_s11, %s1683_s4, %s1683_s4, %s1684_s10  }
  0x56   : > { %197 = sbr.rel (%p1748_p8) target bundleno = 472 (0x1d8), region = 32  ;;  %s1871_s21 = sand.u32 (!%p1748_p8), 1, %s1666_s13  }
  0x57   : > { %s1874_s17 = sshll.u32 (!%p1748_p8), %s1871_s21, 8  ;;  %s200_s22 = scalar_lea.sflag (!%p1748_p8), [#allocation3], %s1871_s21 }
  0x58   : > { %s1878_s8 = scalar_lea.vmem (!%p1748_p8), [#allocation2], %s1874_s17  ;;  %p2059_p7 = scmp.ne.s32.totalorder (!%p1748_p8), %s2052_s18, 0 }
  0x5b   : > { %1645 = dma.done.wait (%p2059_p7), %s200_s22, 4096  }
  0x5c   : > { %1647 = vsyncadd (%p2059_p7), %s200_s22, 4294963200  ;;  %s208_s20 = sand.u32 1, %s1729_s16   ;;  %s1886_s30 = scalar_lea.vmem [#allocation5], %s1874_s17 }
  0x5d   : > { %s209_s23 = scalar_lea.sflag [#allocation6], %s208_s20 }
  0x5e   : > { %1649 = dma.done.wait (%p2059_p7), %s209_s23, 4096  }
  0x5f   : > { %1651 = vsyncadd (%p2059_p7), %s209_s23, 4294963200  ;;  %p2060_p8 = scmp.eq.s32.totalorder %s1729_s16, 0 }
  0x61   : > { %1653 = dma.done.wait (%p2060_p8), [#allocation6], 4096   ;;  %p2061_p11 = pmov %p2060_p8 }
  0x62   : > { %v1488_v0 = vld [vmem:[#allocation7 + $0x78] sm:$0xff]   ;;  %v1492_v4 = vld [vmem:[#allocation7 + $0x70] sm:$0xff]   ;;  %v1496_v8 = vld [vmem:[#allocation7 + $0x68] sm:$0xff]   ;;  %s1931_s18 = scalar_lea.vmem [#allocation8], %s1874_s17  ;;  %s1193_s7 = sshll.u32 %s1729_s16, 12 }
  0x63   : > { %1655 = vsyncadd (%p2061_p11), [#allocation6], 4294963200  ;;  %v1489_v1 = vld [vmem:[#allocation7 + $0xf8] sm:$0xff]   ;;  %1194 = vmatprep.subr.bf16.mxu0 %v1488_v0  ;;  %v1493_v5 = vld [vmem:[#allocation7 + $0xf0] sm:$0xff]   ;;  %s1032_s11 = sshll.u32 %s1931_s18, 4  ;;  %s1999_s9 = scalar_lea.hbm %s2048_s3, %s1193_s7  ;;  %s2001_s11 = int_to_ptr.vmem [resolvable:$true] %s1032_s11 }
  0x64   : > { %v1490_v2 = vld [vmem:[#allocation7 + $0x38] sm:$0xff]   ;;  %1306 = vmatprep.subr.bf16.mxu1 %v1489_v1  ;;  %v1494_v6 = vld [vmem:[#allocation7 + $0x30] sm:$0xff]   ;;  %v1497_v9 = vld [vmem:[#allocation7 + $0xe8] sm:$0xff]   ;;  %s1019_s27 = scalar_lea.sflag [#allocation4], %s1871_s21  ;;  %s1602_s28 = scalar_lea.vmem %s2001_s11, 4096 }
  0x65   : > { %v1491_v3 = vld [vmem:[#allocation7 + $0xb8] sm:$0xff]   ;;  %1195 = vmatpush3.bf16.msra.mxu0 %v1490_v2  ;;  %v1495_v7 = vld [vmem:[#allocation7 + $0xb0] sm:$0xff]   ;;  %v1498_v10 = vld [vmem:[#allocation7 + $0x28] sm:$0xff]   ;;  %p1603_p6 = scmp.ne.s32.totalorder %s2001_s11, %s1602_s28  ;;  %p2062_p10 = scmp.ne.s32.totalorder %s2057_s6, 0 }
  0x66   : > { %1307 = vmatpush3.bf16.msra.mxu1 %v1491_v3  ;;  %1196 = vmatprep.subr.bf16.mxu0 %v1492_v4  ;;  %v1499_v11 = vld [vmem:[#allocation7 + $0xa8] sm:$0xff]   ;;  %v1500_v12 = vld [vmem:[#allocation7 + $0x60] sm:$0xff]   ;;  %v1504_v16 = vld [vmem:[#allocation7 + $0x58] sm:$0xff]   ;;  %s1685_s16 = smov [#allocation8]  }
  0x67   : > { %1308 = vmatprep.subr.bf16.mxu1 %v1493_v5  ;;  %v1501_v13 = vld [vmem:[#allocation7 + $0xe0] sm:$0xff]   ;;  %v1505_v17 = vld [vmem:[#allocation7 + $0xd8] sm:$0xff]   ;;  %v1508_v20 = vld [vmem:[#allocation7 + $0x50] sm:$0xff]   ;;  %p1604_p12 = pnand %p1603_p6, %p2062_p10  ;;  %s1606_s29 = sshll.u32 %s1685_s16, 4  ;;  %s1607_s29 = int_to_ptr.vmem [resolvable:$false] %s1606_s29 }
  0x68   : > { %v1502_v14 = vld [vmem:[#allocation7 + $0x20] sm:$0xff]   ;;  %v1506_v18 = vld [vmem:[#allocation7 + $0x18] sm:$0xff]   ;;  %v1509_v21 = vld [vmem:[#allocation7 + $0xd0] sm:$0xff]   ;;  %s1608_s4 = scalar_lea.vmem %s1607_s29, 8192  ;;  %p1609_p0 = scmp.lt.s32.totalorder %s2001_s11, %s1607_s29 }
  0x69   : > { %1197 = vmatpush3.bf16.msra.mxu0 %v1494_v6  ;;  %v1503_v15 = vld [vmem:[#allocation7 + $0xa0] sm:$0xff]   ;;  %v1507_v19 = vld [vmem:[#allocation7 + $0x98] sm:$0xff]   ;;  %v1510_v22 = vld [vmem:[#allocation7 + $0x10] sm:$0xff]   ;;  %p1605_p13 = pneg %p1604_p12  ;;  %p1610_p5 = scmp.lt.s32.totalorder %s1608_s4, %s1602_s28 }
  0x6a   : > { %1309 = vmatpush3.bf16.msra.mxu1 %v1495_v7  ;;  %1198 = vmatprep.subr.bf16.mxu0 %v1496_v8  ;;  %v1511_v23 = vld [vmem:[#allocation7 + $0x90] sm:$0xff]   ;;  %v1512_v24 = vld [vmem:[#allocation7 + $0x48] sm:$0xff]   ;;  %v1516_v28 = vld [vmem:[#allocation7 + $0x40] sm:$0xff]  }
  0x6b   : > { %1310 = vmatprep.subr.bf16.mxu1 %v1497_v9  ;;  %v1513_v25 = vld [vmem:[#allocation7 + $0xc8] sm:$0xff]   ;;  %v1517_v29 = vld [vmem:[#allocation7 + $0xc0] sm:$0xff]   ;;  %v251_v33 = vld [vmem:[%s1886_s30 + $0x18] sm:$0xff]  ;;  %p1611_p9 = por %p1610_p5, %p1609_p0 }
  0x6c   : > { %v1514_v26 = vld [vmem:[#allocation7 + $0x8] sm:$0xff]   ;;  %v1518_v30 = vld [vmem:[#allocation7] sm:$0xff]   ;;  %v283_v37 = vunpack.c.l.s8.bf16 %v251_v33  ;;  %v287_v38 = vunpack.c.h.s8.bf16 %v251_v33  ;;  %v250_v39 = vld [vmem:[%s1886_s30 + $0x10] sm:$0xff] }
  0x6d   : > { %1199 = vmatpush3.bf16.msra.mxu0 %v1498_v10  ;;  %v1515_v27 = vld [vmem:[#allocation7 + $0x88] sm:$0xff]   ;;  %v1519_v31 = vld [vmem:[#allocation7 + $0x80] sm:$0xff]   ;;  %v282_v41 = vunpack.c.l.s8.bf16 %v250_v39  ;;  %v255_v43 = vld [vmem:[%s1886_s30 + $0x38] sm:$0xff]  ;;  %v286_v45 = vunpack.c.h.s8.bf16 %v250_v39  ;;  %p1612_p2 = pnand %p1611_p9, %p1605_p13 }
  0x6e   : > { %1311 = vmatpush3.bf16.msra.mxu1 %v1499_v11  ;;  %1200 = vmatprep.subr.bf16.mxu0 %v1500_v12  ;;  %v249_v32 = vld [vmem:[%s1886_s30 + $0x8] sm:$0xff]  ;;  %v248_v34 = vld [vmem:[%s1886_s30] sm:$0xff]  ;;  %v291_v47 = vunpack.c.l.s8.bf16 %v255_v43  ;;  %v254_v49 = vld [vmem:[%s1886_s30 + $0x30] sm:$0xff]  ;;  %v295_v53 = vunpack.c.h.s8.bf16 %v255_v43 }
  0x6f   : > { %1312 = vmatprep.subr.bf16.mxu1 %v1501_v13  ;;  %v281_v35 = vunpack.c.l.s8.bf16 %v249_v32  ;;  %v285_v36 = vunpack.c.h.s8.bf16 %v249_v32  ;;  %v280_v40 = vunpack.c.l.s8.bf16 %v248_v34  ;;  %793 = vmatprep.mubr.bf16.mxu1 %v283_v37  ;;  %v253_v42 = vld [vmem:[%s1886_s30 + $0x28] sm:$0xff]  ;;  %v284_v44 = vunpack.c.h.s8.bf16 %v248_v34  ;;  %v252_v48 = vld [vmem:[%s1886_s30 + $0x20] sm:$0xff]  ;;  %v259_v55 = vld [vmem:[%s1886_s30 + $0x58] sm:$0xff] }
  0x70   : > { %v289_v46 = vunpack.c.l.s8.bf16 %v253_v42  ;;  %v288_v50 = vunpack.c.l.s8.bf16 %v252_v48  ;;  %v290_v51 = vunpack.c.l.s8.bf16 %v254_v49  ;;  %v293_v52 = vunpack.c.h.s8.bf16 %v253_v42  ;;  %v257_v54 = vld [vmem:[%s1886_s30 + $0x48] sm:$0xff]  ;;  %v256_v60 = vld [vmem:[%s1886_s30 + $0x40] sm:$0xff]  ;;  %v258_v61 = vld [vmem:[%s1886_s30 + $0x50] sm:$0xff] }
  0x71   : > { %1201 = vmatpush3.bf16.msra.mxu0 %v1502_v14  ;;  %632 = vmatprep.mubr.bf16.mxu0 %v281_v35  ;;  %v292_v56 = vunpack.c.h.s8.bf16 %v252_v48  ;;  %v294_v57 = vunpack.c.h.s8.bf16 %v254_v49  ;;  %v297_v58 = vunpack.c.l.s8.bf16 %v257_v54  ;;  %v299_v59 = vunpack.c.l.s8.bf16 %v259_v55  ;;  %v261_v2 = vld [vmem:[%s1886_s30 + $0x68] sm:$0xff]  ;;  %v263_v3 = vld [vmem:[%s1886_s30 + $0x78] sm:$0xff]  ;;  %v260_v8 = vld [vmem:[%s1886_s30 + $0x60] sm:$0xff] }
  0x72   : > { %1313 = vmatpush3.bf16.msra.mxu1 %v1503_v15  ;;  %1202 = vmatprep.subr.bf16.mxu0 %v1504_v16  ;;  %v296_v62 = vunpack.c.l.s8.bf16 %v256_v60  ;;  %v298_v63 = vunpack.c.l.s8.bf16 %v258_v61  ;;  %v301_v0 = vunpack.c.h.s8.bf16 %v257_v54  ;;  %v303_v1 = vunpack.c.h.s8.bf16 %v259_v55  ;;  %v262_v9 = vld [vmem:[%s1886_s30 + $0x70] sm:$0xff]  ;;  %v265_v14 = vld [vmem:[%s1886_s30 + $0x88] sm:$0xff]  ;;  %v267_v15 = vld [vmem:[%s1886_s30 + $0x98] sm:$0xff] }
  0x73   : > { %1314 = vmatprep.subr.bf16.mxu1 %v1505_v17  ;;  %v300_v4 = vunpack.c.h.s8.bf16 %v256_v60  ;;  %v302_v5 = vunpack.c.h.s8.bf16 %v258_v61  ;;  %v305_v6 = vunpack.c.l.s8.bf16 %v261_v2  ;;  %v307_v7 = vunpack.c.l.s8.bf16 %v263_v3  ;;  %v268_v32 = vld [vmem:[%s1886_s30 + $0xa0] sm:$0xff]  ;;  %v270_v33 = vld [vmem:[%s1886_s30 + $0xb0] sm:$0xff]  ;;  %v275_v39 = vld [vmem:[%s1886_s30 + $0xd8] sm:$0xff] }
  0x74   : > { %v304_v10 = vunpack.c.l.s8.bf16 %v260_v8  ;;  %v306_v11 = vunpack.c.l.s8.bf16 %v262_v9  ;;  %v309_v12 = vunpack.c.h.s8.bf16 %v261_v2  ;;  %v311_v13 = vunpack.c.h.s8.bf16 %v263_v3 }
  0x75   : > { %1203 = vmatpush3.bf16.msra.mxu0 %v1506_v18  ;;  %v308_v16 = vunpack.c.h.s8.bf16 %v260_v8  ;;  %v310_v17 = vunpack.c.h.s8.bf16 %v262_v9  ;;  %v313_v18 = vunpack.c.l.s8.bf16 %v265_v14  ;;  %v320_v34 = vunpack.c.l.s8.bf16 %v268_v32 }
  0x76   : > { %1315 = vmatpush3.bf16.msra.mxu1 %v1507_v19  ;;  %1204 = vmatprep.subr.bf16.mxu0 %v1508_v20  ;;  %v315_v19 = vunpack.c.l.s8.bf16 %v267_v15  ;;  %v264_v20 = vld [vmem:[%s1886_s30 + $0x80] sm:$0xff]  ;;  %v322_v35 = vunpack.c.l.s8.bf16 %v270_v33  ;;  %v331_v43 = vunpack.c.l.s8.bf16 %v275_v39  ;;  %v335_v49 = vunpack.c.h.s8.bf16 %v275_v39 }
  0x77   : > { %1316 = vmatprep.subr.bf16.mxu1 %v1509_v21  ;;  %v266_v21 = vld [vmem:[%s1886_s30 + $0x90] sm:$0xff] }
  0x79   : > { %1205 = vmatpush3.bf16.msra.mxu0 %v1510_v22  ;;  %v312_v22 = vunpack.c.l.s8.bf16 %v264_v20 }
  0x7a   : > { %1317 = vmatpush3.bf16.msra.mxu1 %v1511_v23  ;;  %1206 = vmatprep.subr.bf16.mxu0 %v1512_v24  ;;  %v314_v23 = vunpack.c.l.s8.bf16 %v266_v21  ;;  %v317_v24 = vunpack.c.h.s8.bf16 %v265_v14 }
  0x7b   : > { %1318 = vmatprep.subr.bf16.mxu1 %v1513_v25  ;;  %v319_v25 = vunpack.c.h.s8.bf16 %v267_v15  ;;  %v923_v15 = vld [vmem:[%s1878_s8 + $0x8] sm:$0xff] }
  0x7d   : > { %1207 = vmatpush3.bf16.msra.mxu0 %v1514_v26  ;;  %v269_v26 = vld [vmem:[%s1886_s30 + $0xa8] sm:$0xff] }
  0x7e   : > { %1319 = vmatpush3.bf16.msra.mxu1 %v1515_v27  ;;  %1208 = vmatprep.subr.bf16.mxu0 %v1516_v28  ;;  %v271_v27 = vld [vmem:[%s1886_s30 + $0xb8] sm:$0xff]  ;;  %v316_v28 = vunpack.c.h.s8.bf16 %v264_v20 }
  0x7f   : > { %1320 = vmatprep.subr.bf16.mxu1 %v1517_v29  ;;  %v318_v29 = vunpack.c.h.s8.bf16 %v266_v21  ;;  %v327_v37 = vunpack.c.h.s8.bf16 %v271_v27 }
  0x81   : > { %1209 = vmatpush3.bf16.msra.mxu0 %v1518_v30  ;;  %v321_v30 = vunpack.c.l.s8.bf16 %v269_v26 }
  0x82   : > { %1321 = vmatpush3.bf16.msra.mxu1 %v1519_v31  ;;  %v323_v31 = vunpack.c.l.s8.bf16 %v271_v27 }
  0x84   : > { %633 = vmatmul.mubr.bf16.vlgmr.msra.gmra.mxu0 %v280_v40  ;;  %v324_v40 = vunpack.c.h.s8.bf16 %v268_v32 }
  0x85   : > { %794 = vmatmul.mubr.bf16.vlgmr.msra.gmra.mxu1 %v282_v41  ;;  %640 = vmatprep.mubr.bf16.mxu0 %v285_v36  ;;  %v325_v36 = vunpack.c.h.s8.bf16 %v269_v26  ;;  %v326_v41 = vunpack.c.h.s8.bf16 %v270_v33  ;;  %v925_v33 = vld [vmem:[%s1878_s8 + $0x18] sm:$0xff] }
  0x86   : > { %801 = vmatprep.mubr.bf16.mxu1 %v287_v38  ;;  %v273_v38 = vld [vmem:[%s1886_s30 + $0xc8] sm:$0xff] }
  0x87   : > { %v329_v42 = vunpack.c.l.s8.bf16 %v273_v38  ;;  %v333_v48 = vunpack.c.h.s8.bf16 %v273_v38 }
  0x8c   : > { %641 = vmatmul.mubr.bf16.gmra.mxu0 %v284_v44  ;;  %v272_v44 = vld [vmem:[%s1886_s30 + $0xc0] sm:$0xff] }
  0x8d   : > { %802 = vmatmul.mubr.bf16.gmra.mxu1 %v286_v45  ;;  %648 = vmatprep.mubr.bf16.mxu0 %v289_v46  ;;  %v274_v45 = vld [vmem:[%s1886_s30 + $0xd0] sm:$0xff]  ;;  %v328_v46 = vunpack.c.l.s8.bf16 %v272_v44 }
  0x8e   : > { %809 = vmatprep.mubr.bf16.mxu1 %v291_v47  ;;  %v330_v47 = vunpack.c.l.s8.bf16 %v274_v45 }
  0x94   : > { %649 = vmatmul.mubr.bf16.gmra.mxu0 %v288_v50  ;;  %v277_v50 = vld [vmem:[%s1886_s30 + $0xe8] sm:$0xff] }
  0x95   : > { %810 = vmatmul.mubr.bf16.gmra.mxu1 %v290_v51  ;;  %656 = vmatprep.mubr.bf16.mxu0 %v293_v52  ;;  %v279_v51 = vld [vmem:[%s1886_s30 + $0xf8] sm:$0xff]  ;;  %v332_v52 = vunpack.c.h.s8.bf16 %v272_v44  ;;  %v337_v54 = vunpack.c.l.s8.bf16 %v277_v50  ;;  %v341_v60 = vunpack.c.h.s8.bf16 %v277_v50 }
  0x96   : > { %817 = vmatprep.mubr.bf16.mxu1 %v295_v53  ;;  %v334_v53 = vunpack.c.h.s8.bf16 %v274_v45  ;;  %v339_v55 = vunpack.c.l.s8.bf16 %v279_v51  ;;  %v343_v61 = vunpack.c.h.s8.bf16 %v279_v51  ;;  %v927_v51 = vld [vmem:[%s1878_s8 + $0x28] sm:$0xff] }
  0x9c   : > { %657 = vmatmul.mubr.bf16.gmra.mxu0 %v292_v56  ;;  %v276_v56 = vld [vmem:[%s1886_s30 + $0xe0] sm:$0xff] }
  0x9d   : > { %818 = vmatmul.mubr.bf16.gmra.mxu1 %v294_v57  ;;  %664 = vmatprep.mubr.bf16.mxu0 %v297_v58  ;;  %v278_v57 = vld [vmem:[%s1886_s30 + $0xf0] sm:$0xff]  ;;  %v336_v58 = vunpack.c.l.s8.bf16 %v276_v56 }
  0x9e   : > { %825 = vmatprep.mubr.bf16.mxu1 %v299_v59  ;;  %v338_v59 = vunpack.c.l.s8.bf16 %v278_v57 }
  0xa4   : > { %665 = vmatmul.mubr.bf16.gmra.mxu0 %v296_v62  ;;  %v340_v62 = vunpack.c.h.s8.bf16 %v276_v56 }
  0xa5   : > { %826 = vmatmul.mubr.bf16.gmra.mxu1 %v298_v63  ;;  %672 = vmatprep.mubr.bf16.mxu0 %v301_v0  ;;  %v342_v63 = vunpack.c.h.s8.bf16 %v278_v57 }
  0xa6   : > { %833 = vmatprep.mubr.bf16.mxu1 %v303_v1 }
  0xac   : > { %673 = vmatmul.mubr.bf16.gmra.mxu0 %v300_v4 }
  0xad   : > { %834 = vmatmul.mubr.bf16.gmra.mxu1 %v302_v5  ;;  %680 = vmatprep.mubr.bf16.mxu0 %v305_v6  ;;  %v922_v6 = vld [vmem:[%s1878_s8] sm:$0xff] }
  0xae   : > { %841 = vmatprep.mubr.bf16.mxu1 %v307_v7 }
  0xb4   : > { %681 = vmatmul.mubr.bf16.gmra.mxu0 %v304_v10 }
  0xb5   : > { %842 = vmatmul.mubr.bf16.gmra.mxu1 %v306_v11  ;;  %688 = vmatprep.mubr.bf16.mxu0 %v309_v12 }
  0xb6   : > { %849 = vmatprep.mubr.bf16.mxu1 %v311_v13 }
  0xbc   : > { %689 = vmatmul.mubr.bf16.gmra.mxu0 %v308_v16 }
  0xbd   : > { %850 = vmatmul.mubr.bf16.gmra.mxu1 %v310_v17  ;;  %696 = vmatprep.mubr.bf16.mxu0 %v313_v18 }
  0xbe   : > { %857 = vmatprep.mubr.bf16.mxu1 %v315_v19 }
  0xc4   : > { %697 = vmatmul.mubr.bf16.gmra.mxu0 %v312_v22 }
  0xc5   : > { %858 = vmatmul.mubr.bf16.gmra.mxu1 %v314_v23  ;;  %704 = vmatprep.mubr.bf16.mxu0 %v317_v24  ;;  %v924_v24 = vld [vmem:[%s1878_s8 + $0x10] sm:$0xff] }
  0xc6   : > { %865 = vmatprep.mubr.bf16.mxu1 %v319_v25 }
  0xcc   : > { %705 = vmatmul.mubr.bf16.gmra.mxu0 %v316_v28 }
  0xcd   : > { %866 = vmatmul.mubr.bf16.gmra.mxu1 %v318_v29  ;;  %712 = vmatprep.mubr.bf16.mxu0 %v321_v30 }
  0xce   : > { %873 = vmatprep.mubr.bf16.mxu1 %v323_v31 }
  0xd4   : > { %713 = vmatmul.mubr.bf16.gmra.mxu0 %v320_v34 }
  0xd5   : > { %874 = vmatmul.mubr.bf16.gmra.mxu1 %v322_v35  ;;  %720 = vmatprep.mubr.bf16.mxu0 %v325_v36 }
  0xd6   : > { %881 = vmatprep.mubr.bf16.mxu1 %v327_v37 }
  0xdc   : > { %721 = vmatmul.mubr.bf16.gmra.mxu0 %v324_v40 }
  0xdd   : > { %882 = vmatmul.mubr.bf16.gmra.mxu1 %v326_v41  ;;  %728 = vmatprep.mubr.bf16.mxu0 %v329_v42  ;;  %v926_v42 = vld [vmem:[%s1878_s8 + $0x20] sm:$0xff] }
  0xde   : > { %889 = vmatprep.mubr.bf16.mxu1 %v331_v43 }
  0xe4   : > { %729 = vmatmul.mubr.bf16.gmra.mxu0 %v328_v46 }
  0xe5   : > { %890 = vmatmul.mubr.bf16.gmra.mxu1 %v330_v47  ;;  %736 = vmatprep.mubr.bf16.mxu0 %v333_v48 }
  0xe6   : > { %897 = vmatprep.mubr.bf16.mxu1 %v335_v49 }
  0xec   : > { %737 = vmatmul.mubr.bf16.gmra.mxu0 %v332_v52 }
  0xed   : > { %898 = vmatmul.mubr.bf16.gmra.mxu1 %v334_v53  ;;  %744 = vmatprep.mubr.bf16.mxu0 %v337_v54 }
  0xee   : > { %905 = vmatprep.mubr.bf16.mxu1 %v339_v55 }
  0xf4   : > { %745 = vmatmul.mubr.bf16.gmra.mxu0 %v336_v58 }
  0xf5   : > { %906 = vmatmul.mubr.bf16.gmra.mxu1 %v338_v59  ;;  %752 = vmatprep.mubr.bf16.mxu0 %v341_v60  ;;  %v928_v60 = vld [vmem:[%s1878_s8 + $0x30] sm:$0xff] }
  0xf6   : > { %913 = vmatprep.mubr.bf16.mxu1 %v343_v61 }
  0xfc   : > { %753 = vmatmul.mubr.bf16.gmra.mxu0 %v340_v62 }
  0xfd   : > { %914 = vmatmul.mubr.bf16.gmra.mxu1 %v342_v63 }
 0x144   : > { %v1210_v0 = vpop.f32.mrf.mxu0 }
 0x145   : > { %v1322_v1 = vpop.f32.mrf.mxu1 }
 0x146   : > { %v1211_v2 = vpop.f32.mrf.mxu0 }
 0x147   : > { %v1323_v3 = vpop.f32.mrf.mxu1  ;;  %v1212_v4 = vadd.f32 %v1211_v2, %v1210_v0 }
 0x148   : > { %v1324_v5 = vadd.f32 %v1323_v3, %v1322_v1  ;;  %v1213_v7 = vpop.f32.mrf.mxu0 }
 0x149   : > { %v1325_v8 = vpop.f32.mrf.mxu1 }
 0x14a   : > { %v796_v9 = vadd.f32 %v1324_v5, %v1212_v4  ;;  %v1214_v10 = vpop.f32.mrf.mxu0  ;;  %v929_v5 = vld [vmem:[%s1878_s8 + $0x38] sm:$0xff] }
 0x14b   : > { %v1326_v11 = vpop.f32.mrf.mxu1  ;;  %v1215_v13 = vadd.f32 %v1214_v10, %v1213_v7 }
 0x14c   : > { %v954_v12 = vadd.f32 %v922_v6, %v796_v9  ;;  %v1327_v14 = vadd.f32 %v1326_v11, %v1325_v8  ;;  %v1216_v16 = vpop.f32.mrf.mxu0 }
 0x14d   : > { %v1328_v17 = vpop.f32.mrf.mxu1 }
 0x14e   : > { %986 = vst [vmem:[%s1931_s18] sm:$0xff] %v954_v12  ;;  %v799_v18 = vadd.f32 %v1327_v14, %v1215_v13  ;;  %v1217_v19 = vpop.f32.mrf.mxu0  ;;  %v930_v14 = vld [vmem:[%s1878_s8 + $0x40] sm:$0xff] }
 0x14f   : > { %v1329_v20 = vpop.f32.mrf.mxu1  ;;  %v1218_v22 = vadd.f32 %v1217_v19, %v1216_v16 }
 0x150   : > { %v955_v21 = vadd.f32 %v923_v15, %v799_v18  ;;  %v1330_v23 = vadd.f32 %v1329_v20, %v1328_v17  ;;  %v1219_v25 = vpop.f32.mrf.mxu0 }
 0x151   : > { %v1331_v26 = vpop.f32.mrf.mxu1 }
 0x152   : > { %987 = vst [vmem:[%s1931_s18 + $0x8] sm:$0xff] %v955_v21  ;;  %v804_v27 = vadd.f32 %v1330_v23, %v1218_v22  ;;  %v1220_v28 = vpop.f32.mrf.mxu0  ;;  %v931_v23 = vld [vmem:[%s1878_s8 + $0x48] sm:$0xff] }
 0x153   : > { %v1332_v29 = vpop.f32.mrf.mxu1  ;;  %v1221_v31 = vadd.f32 %v1220_v28, %v1219_v25 }
 0x154   : > { %v956_v30 = vadd.f32 %v924_v24, %v804_v27  ;;  %v1333_v32 = vadd.f32 %v1332_v29, %v1331_v26  ;;  %v1222_v34 = vpop.f32.mrf.mxu0 }
 0x155   : > { %v1334_v35 = vpop.f32.mrf.mxu1 }
 0x156   : > { %988 = vst [vmem:[%s1931_s18 + $0x10] sm:$0xff] %v956_v30  ;;  %v807_v36 = vadd.f32 %v1333_v32, %v1221_v31  ;;  %v1223_v37 = vpop.f32.mrf.mxu0  ;;  %v932_v32 = vld [vmem:[%s1878_s8 + $0x50] sm:$0xff] }
 0x157   : > { %v1335_v38 = vpop.f32.mrf.mxu1  ;;  %v1224_v40 = vadd.f32 %v1223_v37, %v1222_v34 }
 0x158   : > { %v957_v39 = vadd.f32 %v925_v33, %v807_v36  ;;  %v1336_v41 = vadd.f32 %v1335_v38, %v1334_v35  ;;  %v1225_v43 = vpop.f32.mrf.mxu0 }
 0x159   : > { %v1337_v44 = vpop.f32.mrf.mxu1 }
 0x15a   : > { %989 = vst [vmem:[%s1931_s18 + $0x18] sm:$0xff] %v957_v39  ;;  %v812_v45 = vadd.f32 %v1336_v41, %v1224_v40  ;;  %v1226_v46 = vpop.f32.mrf.mxu0  ;;  %v933_v41 = vld [vmem:[%s1878_s8 + $0x58] sm:$0xff] }
 0x15b   : > { %v1338_v47 = vpop.f32.mrf.mxu1  ;;  %v1227_v49 = vadd.f32 %v1226_v46, %v1225_v43 }
 0x15c   : > { %v958_v48 = vadd.f32 %v926_v42, %v812_v45  ;;  %v1339_v50 = vadd.f32 %v1338_v47, %v1337_v44  ;;  %v1228_v52 = vpop.f32.mrf.mxu0 }
 0x15d   : > { %v1340_v53 = vpop.f32.mrf.mxu1 }
 0x15e   : > { %990 = vst [vmem:[%s1931_s18 + $0x20] sm:$0xff] %v958_v48  ;;  %v815_v54 = vadd.f32 %v1339_v50, %v1227_v49  ;;  %v1229_v55 = vpop.f32.mrf.mxu0  ;;  %v934_v50 = vld [vmem:[%s1878_s8 + $0x60] sm:$0xff] }
 0x15f   : > { %v1341_v56 = vpop.f32.mrf.mxu1  ;;  %v1230_v58 = vadd.f32 %v1229_v55, %v1228_v52 }
 0x160   : > { %v959_v57 = vadd.f32 %v927_v51, %v815_v54  ;;  %v1342_v59 = vadd.f32 %v1341_v56, %v1340_v53  ;;  %v1231_v61 = vpop.f32.mrf.mxu0 }
 0x161   : > { %v1343_v62 = vpop.f32.mrf.mxu1 }
 0x162   : > { %991 = vst [vmem:[%s1931_s18 + $0x28] sm:$0xff] %v959_v57  ;;  %v820_v63 = vadd.f32 %v1342_v59, %v1230_v58  ;;  %v1232_v0 = vpop.f32.mrf.mxu0  ;;  %v935_v59 = vld [vmem:[%s1878_s8 + $0x68] sm:$0xff] }
 0x163   : > { %v1344_v1 = vpop.f32.mrf.mxu1  ;;  %v1233_v3 = vadd.f32 %v1232_v0, %v1231_v61 }
 0x164   : > { %v960_v2 = vadd.f32 %v928_v60, %v820_v63  ;;  %v1345_v4 = vadd.f32 %v1344_v1, %v1343_v62  ;;  %v1234_v6 = vpop.f32.mrf.mxu0 }
 0x165   : > { %v1346_v7 = vpop.f32.mrf.mxu1 }
 0x166   : > { %992 = vst [vmem:[%s1931_s18 + $0x30] sm:$0xff] %v960_v2  ;;  %v823_v8 = vadd.f32 %v1345_v4, %v1233_v3  ;;  %v1235_v9 = vpop.f32.mrf.mxu0  ;;  %v936_v4 = vld [vmem:[%s1878_s8 + $0x70] sm:$0xff] }
 0x167   : > { %v1347_v10 = vpop.f32.mrf.mxu1  ;;  %v1236_v12 = vadd.f32 %v1235_v9, %v1234_v6 }
 0x168   : > { %v961_v11 = vadd.f32 %v929_v5, %v823_v8  ;;  %v1348_v13 = vadd.f32 %v1347_v10, %v1346_v7  ;;  %v1237_v15 = vpop.f32.mrf.mxu0 }
 0x169   : > { %v1349_v16 = vpop.f32.mrf.mxu1 }
 0x16a   : > { %993 = vst [vmem:[%s1931_s18 + $0x38] sm:$0xff] %v961_v11  ;;  %v828_v17 = vadd.f32 %v1348_v13, %v1236_v12  ;;  %v1238_v18 = vpop.f32.mrf.mxu0  ;;  %v937_v13 = vld [vmem:[%s1878_s8 + $0x78] sm:$0xff] }
 0x16b   : > { %v1350_v19 = vpop.f32.mrf.mxu1  ;;  %v1239_v21 = vadd.f32 %v1238_v18, %v1237_v15 }
 0x16c   : > { %v962_v20 = vadd.f32 %v930_v14, %v828_v17  ;;  %v1351_v22 = vadd.f32 %v1350_v19, %v1349_v16  ;;  %v1240_v24 = vpop.f32.mrf.mxu0 }
 0x16d   : > { %v1352_v25 = vpop.f32.mrf.mxu1 }
 0x16e   : > { %994 = vst [vmem:[%s1931_s18 + $0x40] sm:$0xff] %v962_v20  ;;  %v831_v26 = vadd.f32 %v1351_v22, %v1239_v21  ;;  %v1241_v27 = vpop.f32.mrf.mxu0  ;;  %v938_v22 = vld [vmem:[%s1878_s8 + $0x80] sm:$0xff] }
 0x16f   : > { %v1353_v28 = vpop.f32.mrf.mxu1  ;;  %v1242_v30 = vadd.f32 %v1241_v27, %v1240_v24 }
 0x170   : > { %v963_v29 = vadd.f32 %v931_v23, %v831_v26  ;;  %v1354_v31 = vadd.f32 %v1353_v28, %v1352_v25  ;;  %v1243_v33 = vpop.f32.mrf.mxu0 }
 0x171   : > { %v1355_v34 = vpop.f32.mrf.mxu1 }
 0x172   : > { %995 = vst [vmem:[%s1931_s18 + $0x48] sm:$0xff] %v963_v29  ;;  %v836_v35 = vadd.f32 %v1354_v31, %v1242_v30  ;;  %v1244_v36 = vpop.f32.mrf.mxu0  ;;  %v939_v31 = vld [vmem:[%s1878_s8 + $0x88] sm:$0xff] }
 0x173   : > { %v1356_v37 = vpop.f32.mrf.mxu1  ;;  %v1245_v39 = vadd.f32 %v1244_v36, %v1243_v33 }
 0x174   : > { %v964_v38 = vadd.f32 %v932_v32, %v836_v35  ;;  %v1357_v40 = vadd.f32 %v1356_v37, %v1355_v34  ;;  %v1246_v42 = vpop.f32.mrf.mxu0 }
 0x175   : > { %v1358_v43 = vpop.f32.mrf.mxu1 }
 0x176   : > { %996 = vst [vmem:[%s1931_s18 + $0x50] sm:$0xff] %v964_v38  ;;  %v839_v44 = vadd.f32 %v1357_v40, %v1245_v39  ;;  %v1247_v45 = vpop.f32.mrf.mxu0  ;;  %v940_v40 = vld [vmem:[%s1878_s8 + $0x90] sm:$0xff] }
 0x177   : > { %v1359_v46 = vpop.f32.mrf.mxu1  ;;  %v1248_v48 = vadd.f32 %v1247_v45, %v1246_v42 }
 0x178   : > { %v965_v47 = vadd.f32 %v933_v41, %v839_v44  ;;  %v1360_v49 = vadd.f32 %v1359_v46, %v1358_v43  ;;  %v1249_v51 = vpop.f32.mrf.mxu0 }
 0x179   : > { %v1361_v52 = vpop.f32.mrf.mxu1 }
 0x17a   : > { %997 = vst [vmem:[%s1931_s18 + $0x58] sm:$0xff] %v965_v47  ;;  %v844_v53 = vadd.f32 %v1360_v49, %v1248_v48  ;;  %v1250_v54 = vpop.f32.mrf.mxu0  ;;  %v941_v49 = vld [vmem:[%s1878_s8 + $0x98] sm:$0xff] }
 0x17b   : > { %v1362_v55 = vpop.f32.mrf.mxu1  ;;  %v1251_v57 = vadd.f32 %v1250_v54, %v1249_v51 }
 0x17c   : > { %v966_v56 = vadd.f32 %v934_v50, %v844_v53  ;;  %v1363_v58 = vadd.f32 %v1362_v55, %v1361_v52  ;;  %v1252_v60 = vpop.f32.mrf.mxu0 }
 0x17d   : > { %v1364_v61 = vpop.f32.mrf.mxu1 }
 0x17e   : > { %998 = vst [vmem:[%s1931_s18 + $0x60] sm:$0xff] %v966_v56  ;;  %v847_v62 = vadd.f32 %v1363_v58, %v1251_v57  ;;  %v1253_v63 = vpop.f32.mrf.mxu0  ;;  %v942_v58 = vld [vmem:[%s1878_s8 + $0xa0] sm:$0xff] }
 0x17f   : > { %v1365_v0 = vpop.f32.mrf.mxu1  ;;  %v1254_v2 = vadd.f32 %v1253_v63, %v1252_v60 }
 0x180   : > { %v967_v1 = vadd.f32 %v935_v59, %v847_v62  ;;  %v1366_v3 = vadd.f32 %v1365_v0, %v1364_v61  ;;  %v1255_v5 = vpop.f32.mrf.mxu0 }
 0x181   : > { %v1367_v6 = vpop.f32.mrf.mxu1 }
 0x182   : > { %999 = vst [vmem:[%s1931_s18 + $0x68] sm:$0xff] %v967_v1  ;;  %v852_v7 = vadd.f32 %v1366_v3, %v1254_v2  ;;  %v1256_v8 = vpop.f32.mrf.mxu0  ;;  %v943_v3 = vld [vmem:[%s1878_s8 + $0xa8] sm:$0xff] }
 0x183   : > { %v1368_v9 = vpop.f32.mrf.mxu1  ;;  %v1257_v11 = vadd.f32 %v1256_v8, %v1255_v5 }
 0x184   : > { %v968_v10 = vadd.f32 %v936_v4, %v852_v7  ;;  %v1369_v12 = vadd.f32 %v1368_v9, %v1367_v6  ;;  %v1258_v14 = vpop.f32.mrf.mxu0 }
 0x185   : > { %v1370_v15 = vpop.f32.mrf.mxu1 }
 0x186   : > { %1000 = vst [vmem:[%s1931_s18 + $0x70] sm:$0xff] %v968_v10  ;;  %v855_v16 = vadd.f32 %v1369_v12, %v1257_v11  ;;  %v1259_v17 = vpop.f32.mrf.mxu0  ;;  %v944_v12 = vld [vmem:[%s1878_s8 + $0xb0] sm:$0xff] }
 0x187   : > { %v1371_v18 = vpop.f32.mrf.mxu1  ;;  %v1260_v20 = vadd.f32 %v1259_v17, %v1258_v14 }
 0x188   : > { %v969_v19 = vadd.f32 %v937_v13, %v855_v16  ;;  %v1372_v21 = vadd.f32 %v1371_v18, %v1370_v15  ;;  %v1261_v23 = vpop.f32.mrf.mxu0 }
 0x189   : > { %v1373_v24 = vpop.f32.mrf.mxu1 }
 0x18a   : > { %1001 = vst [vmem:[%s1931_s18 + $0x78] sm:$0xff] %v969_v19  ;;  %v860_v25 = vadd.f32 %v1372_v21, %v1260_v20  ;;  %v1262_v26 = vpop.f32.mrf.mxu0  ;;  %v945_v21 = vld [vmem:[%s1878_s8 + $0xb8] sm:$0xff] }
 0x18b   : > { %v1374_v27 = vpop.f32.mrf.mxu1  ;;  %v1263_v29 = vadd.f32 %v1262_v26, %v1261_v23 }
 0x18c   : > { %v970_v28 = vadd.f32 %v938_v22, %v860_v25  ;;  %v1375_v30 = vadd.f32 %v1374_v27, %v1373_v24  ;;  %v1264_v32 = vpop.f32.mrf.mxu0 }
 0x18d   : > { %v1376_v33 = vpop.f32.mrf.mxu1 }
 0x18e   : > { %1002 = vst [vmem:[%s1931_s18 + $0x80] sm:$0xff] %v970_v28  ;;  %v863_v34 = vadd.f32 %v1375_v30, %v1263_v29  ;;  %v1265_v35 = vpop.f32.mrf.mxu0  ;;  %v946_v30 = vld [vmem:[%s1878_s8 + $0xc0] sm:$0xff] }
 0x18f   : > { %v1377_v36 = vpop.f32.mrf.mxu1  ;;  %v1266_v38 = vadd.f32 %v1265_v35, %v1264_v32 }
 0x190   : > { %v971_v37 = vadd.f32 %v939_v31, %v863_v34  ;;  %v1378_v39 = vadd.f32 %v1377_v36, %v1376_v33  ;;  %v1267_v41 = vpop.f32.mrf.mxu0 }
 0x191   : > { %v1379_v42 = vpop.f32.mrf.mxu1 }
 0x192   : > { %1003 = vst [vmem:[%s1931_s18 + $0x88] sm:$0xff] %v971_v37  ;;  %v868_v43 = vadd.f32 %v1378_v39, %v1266_v38  ;;  %v1268_v44 = vpop.f32.mrf.mxu0  ;;  %v947_v39 = vld [vmem:[%s1878_s8 + $0xc8] sm:$0xff] }
 0x193   : > { %v1380_v45 = vpop.f32.mrf.mxu1  ;;  %v1269_v47 = vadd.f32 %v1268_v44, %v1267_v41 }
 0x194   : > { %v972_v46 = vadd.f32 %v940_v40, %v868_v43  ;;  %v1381_v48 = vadd.f32 %v1380_v45, %v1379_v42  ;;  %v1270_v50 = vpop.f32.mrf.mxu0 }
 0x195   : > { %v1382_v51 = vpop.f32.mrf.mxu1 }
 0x196   : > { %1004 = vst [vmem:[%s1931_s18 + $0x90] sm:$0xff] %v972_v46  ;;  %v871_v52 = vadd.f32 %v1381_v48, %v1269_v47  ;;  %v1271_v53 = vpop.f32.mrf.mxu0  ;;  %v948_v48 = vld [vmem:[%s1878_s8 + $0xd0] sm:$0xff] }
 0x197   : > { %v1383_v54 = vpop.f32.mrf.mxu1  ;;  %v1272_v56 = vadd.f32 %v1271_v53, %v1270_v50 }
 0x198   : > { %v973_v55 = vadd.f32 %v941_v49, %v871_v52  ;;  %v1384_v57 = vadd.f32 %v1383_v54, %v1382_v51  ;;  %v1273_v59 = vpop.f32.mrf.mxu0 }
 0x199   : > { %v1385_v60 = vpop.f32.mrf.mxu1 }
 0x19a   : > { %1005 = vst [vmem:[%s1931_s18 + $0x98] sm:$0xff] %v973_v55  ;;  %v876_v61 = vadd.f32 %v1384_v57, %v1272_v56  ;;  %v1274_v62 = vpop.f32.mrf.mxu0  ;;  %v949_v57 = vld [vmem:[%s1878_s8 + $0xd8] sm:$0xff] }
 0x19b   : > { %v1386_v63 = vpop.f32.mrf.mxu1  ;;  %v1275_v1 = vadd.f32 %v1274_v62, %v1273_v59 }
 0x19c   : > { %v974_v0 = vadd.f32 %v942_v58, %v876_v61  ;;  %v1387_v2 = vadd.f32 %v1386_v63, %v1385_v60  ;;  %v1276_v4 = vpop.f32.mrf.mxu0 }
 0x19d   : > { %v1388_v5 = vpop.f32.mrf.mxu1 }
 0x19e   : > { %1006 = vst [vmem:[%s1931_s18 + $0xa0] sm:$0xff] %v974_v0  ;;  %v879_v6 = vadd.f32 %v1387_v2, %v1275_v1  ;;  %v1277_v7 = vpop.f32.mrf.mxu0  ;;  %v950_v2 = vld [vmem:[%s1878_s8 + $0xe0] sm:$0xff] }
 0x19f   : > { %v1389_v8 = vpop.f32.mrf.mxu1  ;;  %v1278_v10 = vadd.f32 %v1277_v7, %v1276_v4 }
 0x1a0   : > { %v975_v9 = vadd.f32 %v943_v3, %v879_v6  ;;  %v1390_v11 = vadd.f32 %v1389_v8, %v1388_v5  ;;  %v1279_v13 = vpop.f32.mrf.mxu0 }
 0x1a1   : > { %v1391_v14 = vpop.f32.mrf.mxu1 }
 0x1a2   : > { %1007 = vst [vmem:[%s1931_s18 + $0xa8] sm:$0xff] %v975_v9  ;;  %v884_v15 = vadd.f32 %v1390_v11, %v1278_v10  ;;  %v1280_v16 = vpop.f32.mrf.mxu0  ;;  %v951_v11 = vld [vmem:[%s1878_s8 + $0xe8] sm:$0xff] }
 0x1a3   : > { %v1392_v17 = vpop.f32.mrf.mxu1  ;;  %v1281_v19 = vadd.f32 %v1280_v16, %v1279_v13 }
 0x1a4   : > { %v976_v18 = vadd.f32 %v944_v12, %v884_v15  ;;  %v1393_v20 = vadd.f32 %v1392_v17, %v1391_v14  ;;  %v1282_v22 = vpop.f32.mrf.mxu0 }
 0x1a5   : > { %v1394_v23 = vpop.f32.mrf.mxu1 }
 0x1a6   : > { %1008 = vst [vmem:[%s1931_s18 + $0xb0] sm:$0xff] %v976_v18  ;;  %v887_v24 = vadd.f32 %v1393_v20, %v1281_v19  ;;  %v1283_v25 = vpop.f32.mrf.mxu0  ;;  %v952_v20 = vld [vmem:[%s1878_s8 + $0xf0] sm:$0xff] }
 0x1a7   : > { %v1395_v26 = vpop.f32.mrf.mxu1  ;;  %v1284_v28 = vadd.f32 %v1283_v25, %v1282_v22 }
 0x1a8   : > { %v977_v27 = vadd.f32 %v945_v21, %v887_v24  ;;  %v1396_v29 = vadd.f32 %v1395_v26, %v1394_v23  ;;  %v1285_v31 = vpop.f32.mrf.mxu0 }
 0x1a9   : > { %v1397_v32 = vpop.f32.mrf.mxu1 }
 0x1aa   : > { %1009 = vst [vmem:[%s1931_s18 + $0xb8] sm:$0xff] %v977_v27  ;;  %v892_v33 = vadd.f32 %v1396_v29, %v1284_v28  ;;  %v1286_v34 = vpop.f32.mrf.mxu0  ;;  %v953_v29 = vld [vmem:[%s1878_s8 + $0xf8] sm:$0xff] }
 0x1ab   : > { %v1398_v35 = vpop.f32.mrf.mxu1  ;;  %v1287_v37 = vadd.f32 %v1286_v34, %v1285_v31 }
 0x1ac   : > { %v978_v36 = vadd.f32 %v946_v30, %v892_v33  ;;  %v1399_v38 = vadd.f32 %v1398_v35, %v1397_v32  ;;  %v1288_v40 = vpop.f32.mrf.mxu0 }
 0x1ad   : > { %v1400_v41 = vpop.f32.mrf.mxu1 }
 0x1ae   : > { %1010 = vst [vmem:[%s1931_s18 + $0xc0] sm:$0xff] %v978_v36  ;;  %v895_v42 = vadd.f32 %v1399_v38, %v1287_v37  ;;  %v1289_v43 = vpop.f32.mrf.mxu0 }
 0x1af   : > { %v1401_v44 = vpop.f32.mrf.mxu1  ;;  %v1290_v46 = vadd.f32 %v1289_v43, %v1288_v40 }
 0x1b0   : > { %v979_v45 = vadd.f32 %v947_v39, %v895_v42  ;;  %v1402_v47 = vadd.f32 %v1401_v44, %v1400_v41  ;;  %v1291_v49 = vpop.f32.mrf.mxu0 }
 0x1b1   : > { %v1403_v50 = vpop.f32.mrf.mxu1 }
 0x1b2   : > { %1011 = vst [vmem:[%s1931_s18 + $0xc8] sm:$0xff] %v979_v45  ;;  %v900_v51 = vadd.f32 %v1402_v47, %v1290_v46  ;;  %v1292_v52 = vpop.f32.mrf.mxu0 }
 0x1b3   : > { %v1404_v53 = vpop.f32.mrf.mxu1  ;;  %v1293_v55 = vadd.f32 %v1292_v52, %v1291_v49 }
 0x1b4   : > { %v980_v54 = vadd.f32 %v948_v48, %v900_v51  ;;  %v1405_v56 = vadd.f32 %v1404_v53, %v1403_v50  ;;  %v1294_v58 = vpop.f32.mrf.mxu0 }
 0x1b5   : > { %v1406_v59 = vpop.f32.mrf.mxu1 }
 0x1b6   : > { %1012 = vst [vmem:[%s1931_s18 + $0xd0] sm:$0xff] %v980_v54  ;;  %v903_v60 = vadd.f32 %v1405_v56, %v1293_v55  ;;  %v1295_v61 = vpop.f32.mrf.mxu0 }
 0x1b7   : > { %v1407_v62 = vpop.f32.mrf.mxu1  ;;  %v1296_v0 = vadd.f32 %v1295_v61, %v1294_v58 }
 0x1b8   : > { %v981_v63 = vadd.f32 %v949_v57, %v903_v60  ;;  %v1408_v1 = vadd.f32 %v1407_v62, %v1406_v59  ;;  %v1297_v3 = vpop.f32.mrf.mxu0 }
 0x1b9   : > { %v1409_v4 = vpop.f32.mrf.mxu1 }
 0x1ba   : > { %1013 = vst [vmem:[%s1931_s18 + $0xd8] sm:$0xff] %v981_v63  ;;  %v908_v5 = vadd.f32 %v1408_v1, %v1296_v0  ;;  %v1298_v6 = vpop.f32.mrf.mxu0 }
 0x1bb   : > { %v1410_v7 = vpop.f32.mrf.mxu1  ;;  %v1299_v9 = vadd.f32 %v1298_v6, %v1297_v3 }
 0x1bc   : > { %v982_v8 = vadd.f32 %v950_v2, %v908_v5  ;;  %v1411_v10 = vadd.f32 %v1410_v7, %v1409_v4  ;;  %v1300_v12 = vpop.f32.mrf.mxu0 }
 0x1bd   : > { %v1412_v13 = vpop.f32.mrf.mxu1 }
 0x1be   : > { %1014 = vst [vmem:[%s1931_s18 + $0xe0] sm:$0xff] %v982_v8  ;;  %v911_v14 = vadd.f32 %v1411_v10, %v1299_v9  ;;  %v1301_v15 = vpop.f32.mrf.mxu0 }
 0x1bf   : > { %v1413_v16 = vpop.f32.mrf.mxu1  ;;  %v1302_v18 = vadd.f32 %v1301_v15, %v1300_v12 }
 0x1c0   : > { %v983_v17 = vadd.f32 %v951_v11, %v911_v14  ;;  %v1414_v19 = vadd.f32 %v1413_v16, %v1412_v13  ;;  %v1303_v21 = vpop.f32.mrf.mxu0 }
 0x1c1   : > { %v1415_v22 = vpop.f32.mrf.mxu1 }
 0x1c2   : > { %1015 = vst [vmem:[%s1931_s18 + $0xe8] sm:$0xff] %v983_v17  ;;  %v916_v23 = vadd.f32 %v1414_v19, %v1302_v18  ;;  %v1304_v24 = vpop.f32.mrf.mxu0 }
 0x1c3   : > { %v1416_v25 = vpop.f32.mrf.mxu1  ;;  %v1305_v27 = vadd.f32 %v1304_v24, %v1303_v21 }
 0x1c4   : > { %v984_v26 = vadd.f32 %v952_v20, %v916_v23  ;;  %v1417_v28 = vadd.f32 %v1416_v25, %v1415_v22 }
 0x1c6   : > { %1016 = vst [vmem:[%s1931_s18 + $0xf0] sm:$0xff] %v984_v26  ;;  %v919_v30 = vadd.f32 %v1417_v28, %v1305_v27 }
 0x1c8   : > { %v985_v31 = vadd.f32 %v953_v29, %v919_v30 }
 0x1ca   : > { %1017 = vst [vmem:[%s1931_s18 + $0xf8] sm:$0xff] %v985_v31 }
 0x1cb   : > { %1615 = shalt.err (!%p1612_p2)
}
 0x1cc   : > { %s1616_s10 = scalar_lea.hbm %s1999_s9, 4096  ;;  %s1620_s8 = scalar_lea.hbm %s2048_s3, 8192 }
 0x1cd   : > { %p1617_p1 = scmp.ne.s32.totalorder %s1999_s9, %s1616_s10  ;;  %p1621_p7 = scmp.lt.s32.totalorder %s1999_s9, %s2048_s3 }
 0x1ce   : > { %p1622_p8 = scmp.lt.s32.totalorder %s1620_s8, %s1616_s10 }
 0x1cf   : > { %p1618_p4 = pnand %p1617_p1, %p2062_p10 }
 0x1d0   : > { %p1623_p11 = por %p1622_p8, %p1621_p7 }
 0x1d1   : > { %p1619_p3 = pneg %p1618_p4 }
 0x1d3   : > { %p1624_p6 = pnand %p1623_p11, %p1619_p3 }
 0x1d5   : > { %1627 = shalt.err (!%p1624_p6)
}
 0x1d6   : > { %s1686_s30 = smov 128   ;;  %s1687_s18 = smov 8  }
 0x1d7   : > { %1426 = dma.vmem_to_hbm [thread:$0]  (%p2062_p10), %s2001_s11, 4096, %s1999_s9, %s1019_s27, %s1686_s30, %s1686_s30, %s1687_s18  }
 0x1d8 PF: > { %s1047_s7 = sand.u32 1, %s1662_s12   ;;  %p2063_p12 = scmp.ne.s32.totalorder %s2053_s19, 0 }
 0x1d9   : > { %p2064_p13 = scmp.ge.s32.totalorder %s1674_s15, 2  ;;  %s1048_s25 = scalar_lea.sflag [#allocation4], %s1047_s7 }
 0x1db   : > { %p1440_p0 = pnand %p2064_p13, %p2063_p12 }
 0x1dd   : > { %p1441_p5 = pneg %p1440_p0 }
 0x1df   : > { %1657 = dma.done.wait (%p1441_p5), %s1048_s25, 4096  }
 0x1e0   : > { %1659 = vsyncadd (%p1441_p5), %s1048_s25, 4294963200  ;;  %p19_p9 = scmp.ge.s32.totalorder %s1762_s24, 4   ;;  %s2065_s12 = smov %s1666_s13 }
 0x1e1   : > { %s2066_s13 = smov %s1670_s14  ;;  %s2067_s14 = smov %s1779_s5 }
 0x1e2   : > { %s2068_s15 = smov %s1762_s24  ;;  %21 = sbr.rel (!%p19_p9) target bundleno = 7 (0x7), region = 94 }
 0x1e7   :  { %1053 = vsyncpa [#allocation3], 1 }
 0x1e8   :  { %1055 = vsyncpa [#allocation3 + $0x1], 1 }
 0x1e9   :  { %1056 = vsyncpa [#allocation6], 1 }
 0x1ea   :  { %1058 = vsyncpa [#allocation6 + $0x1], 1 }
 0x1eb   :  { %1059 = vsyncpa [#allocation4], 1 }
 0x1ec   :  { %1061 = vsyncpa [#allocation4 + $0x1], 1 }

</bundles_post_ra>
